<compile_context>
chip_gen: v7x
topology: tpu7x:2x2x1
jax: 0.10.0
libtpu: 0.0.40
codegen_flags: <defaults>
</compile_context>

<pallas_src>
import jax
import jax.numpy as jnp
from jax import lax
from jax.experimental import pallas as pl
from jax.experimental.pallas import tpu as pltpu

MARGIN = 0.5
COS_EPS = 1e-8  # torch.nn.functional.cosine_similarity default eps


def _contrastive_loss_kernel(x1_ref, x2_ref, lab_ref, loss_ref):
    x1 = x1_ref[...].astype(jnp.float32)          # (TB, D)
    x2 = x2_ref[...].astype(jnp.float32)          # (TB, D)
    lab = lab_ref[...].astype(jnp.float32)        # (TB, 1)

    # Row-wise reductions over the feature (lane) axis -> XLU.
    dot = jnp.sum(x1 * x2, axis=-1, keepdims=True)    # (TB, 1)
    n1sq = jnp.sum(x1 * x1, axis=-1, keepdims=True)   # (TB, 1)
    n2sq = jnp.sum(x2 * x2, axis=-1, keepdims=True)   # (TB, 1)

    # cos = dot / (max(||x1||, eps) * max(||x2||, eps)) via two EUP rsqrts on
    # the squared norms: sqrt is monotone, so max(n, eps) == sqrt(max(n^2, eps^2)).
    eps_sq = COS_EPS * COS_EPS
    cos = dot * lax.rsqrt(jnp.maximum(n1sq, eps_sq)) \
              * lax.rsqrt(jnp.maximum(n2sq, eps_sq))

    pos_term = jnp.square(jnp.maximum(cos - MARGIN, 0.0))   # (1 - label) branch
    neg_term = jnp.square(1.0 - cos)                        # label branch
    # (1-l)*pos + l*neg == pos + l*(neg - pos)
    loss_ref[...] = pos_term + lab * (neg_term - pos_term)  # per-sample loss


def _pick_batch_tile(B, D, itemsize):
    """Largest batch tile whose 2 inputs x 2 pipeline buffers stay well under
    the smallest scoped-VMEM default (16 MiB on v5e; conservative for v7x's
    64 MiB physical VMEM), capped at 8192 rows so each step's DMA is large
    enough to amortize per-step overhead without over-allocating."""
    budget = 8 * 1024 * 1024                       # bytes for double-buffered x1+x2
    tb = budget // (2 * 2 * max(D, 1) * itemsize)
    tb = int(max(8, min(tb, 8192)))
    tb = (tb // 8) * 8                             # sublane alignment
    if tb >= B:
        return B                                   # single full block
    return tb


def contrastive_loss(outputs1, outputs2, labels, *, block_rows=None):
    """outputs1, outputs2: (B, D); labels: (B,) -> scalar float32 loss."""
    B, D = outputs1.shape
    labels2d = labels.reshape(B, 1).astype(jnp.float32)

    itemsize = jnp.dtype(outputs1.dtype).itemsize
    tb = block_rows if block_rows is not None else _pick_batch_tile(B, D, itemsize)
    tb = min(int(tb), B)
    if tb < B:
        tb = max(8, (tb // 8) * 8)                 # (8, 128) sublane constraint
    grid = (pl.cdiv(B, tb),)

    cost = pl.CostEstimate(
        flops=8 * B * D + 12 * B,
        transcendentals=2 * B,                     # two rsqrts per row
        bytes_accessed=2 * B * D * itemsize + B * 4 + B * 4,
    )

    per_sample = pl.pallas_call(
        _contrastive_loss_kernel,
        out_shape=jax.ShapeDtypeStruct((B, 1), jnp.float32),
        grid=grid,
        in_specs=[
            pl.BlockSpec((tb, D), lambda i: (i, 0)),
            pl.BlockSpec((tb, D), lambda i: (i, 0)),
            pl.BlockSpec((tb, 1), lambda i: (i, 0)),
        ],
        out_specs=pl.BlockSpec((tb, 1), lambda i: (i, 0)),
        compiler_params=pltpu.CompilerParams(
            dimension_semantics=("parallel",)),
        cost_estimate=cost,
    )(outputs1, outputs2, labels2d)

    # Tiny O(B) finalize in plain JAX (keeps the grid axis fully parallel).
    return jnp.mean(per_sample)


def _reference(outputs1, outputs2, labels):
    x1 = outputs1.astype(jnp.float32)
    x2 = outputs2.astype(jnp.float32)
    n1 = jnp.maximum(jnp.sqrt(jnp.sum(x1 * x1, axis=-1)), COS_EPS)
    n2 = jnp.maximum(jnp.sqrt(jnp.sum(x2 * x2, axis=-1)), COS_EPS)
    cos = jnp.sum(x1 * x2, axis=-1) / (n1 * n2)
    lab = labels.astype(jnp.float32)
    return jnp.mean((1.0 - lab) * jnp.square(jnp.maximum(cos - MARGIN, 0.0))
                    + lab * jnp.square(1.0 - cos))


if __name__ == "__main__":
    key = jax.random.PRNGKey(0)

    # Case 1: small embedding batch consistent with the module's usage
    # (single full block, block dims == array dims).
    B, D = 8, 32
    k1, k2, k3, k4 = jax.random.split(key, 4)
    outputs1 = jax.random.normal(k1, (B, D), dtype=jnp.float32)
    outputs2 = jax.random.normal(k2, (B, D), dtype=jnp.float32)
    labels = jax.random.bernoulli(k3, 0.5, (B,)).astype(jnp.float32)

    loss = contrastive_loss(outputs1, outputs2, labels)
    jax.block_until_ready(loss)
    ref = _reference(outputs1, outputs2, labels)
    assert jnp.allclose(loss, ref, atol=1e-5, rtol=1e-5), (loss, ref)

    # Case 2: exercise the tiled / multi-block (pipelined, parallel) path.
    B2, D2 = 64, 32
    k5, k6, k7, k8 = jax.random.split(k4, 4)
    o1 = jax.random.normal(k5, (B2, D2), dtype=jnp.float32)
    o2 = jax.random.normal(k6, (B2, D2), dtype=jnp.float32)
    lab2 = jax.random.bernoulli(k7, 0.5, (B2,)).astype(jnp.float32)

    loss2 = contrastive_loss(o1, o2, lab2, block_rows=16)
    jax.block_until_ready(loss2)
    ref2 = _reference(o1, o2, lab2)
    assert jnp.allclose(loss2, ref2, atol=1e-5, rtol=1e-5), (loss2, ref2)

    # Case 3: bf16 inputs (upcast happens inside the kernel; halves HBM reads).
    k9, k10, k11 = jax.random.split(k8, 3)
    o1b = jax.random.normal(k9, (B2, D2), dtype=jnp.float32).astype(jnp.bfloat16)
    o2b = jax.random.normal(k10, (B2, D2), dtype=jnp.float32).astype(jnp.bfloat16)
    lab3 = jax.random.bernoulli(k11, 0.5, (B2,)).astype(jnp.float32)

    loss3 = contrastive_loss(o1b, o2b, lab3, block_rows=32)
    jax.block_until_ready(loss3)
    ref3 = _reference(o1b, o2b, lab3)
    assert jnp.allclose(loss3, ref3, atol=1e-4, rtol=1e-4), (loss3, ref3)

    print("KERNEL_OK")
</pallas_src>

<mosaic_0001>
module attributes {stable_mosaic.version = 11 : i64} {
  func.func @_contrastive_loss_kernel(%arg0: i32, %arg1: memref<8x32xf32, #tpu.memory_space<vmem>>, %arg2: memref<8x32xf32, #tpu.memory_space<vmem>>, %arg3: memref<8x1xf32, #tpu.memory_space<vmem>>, %arg4: memref<8x1xf32, #tpu.memory_space<vmem>>) attributes {dimension_semantics = [#tpu.dimension_semantics<parallel>], iteration_bounds = array<i64: 1>, scalar_prefetch = 0 : i64, scratch_operands = 0 : i64, tpu.core_type = #tpu.core_type<tc>, window_params = [{transform_indices = @transform_0, window_bounds = array<i64: 8, 32>}, {transform_indices = @transform_1, window_bounds = array<i64: 8, 32>}, {transform_indices = @transform_2, window_bounds = array<i64: 8, 1>}, {transform_indices = @transform_3, window_bounds = array<i64: 8, 1>}]} {
    %c0 = arith.constant 0 : index
    %c0_0 = arith.constant 0 : index
    %0 = vector.load %arg1[%c0, %c0_0] : memref<8x32xf32, #tpu.memory_space<vmem>>, vector<8x32xf32>
    %c0_1 = arith.constant 0 : index
    %c0_2 = arith.constant 0 : index
    %1 = vector.load %arg2[%c0_1, %c0_2] : memref<8x32xf32, #tpu.memory_space<vmem>>, vector<8x32xf32>
    %c0_3 = arith.constant 0 : index
    %c0_4 = arith.constant 0 : index
    %2 = vector.load %arg3[%c0_3, %c0_4] : memref<8x1xf32, #tpu.memory_space<vmem>>, vector<8x1xf32>
    %3 = arith.mulf %0, %1 : vector<8x32xf32>
    %cst = arith.constant dense<0.000000e+00> : vector<8xf32>
    %4 = vector.multi_reduction <add>, %3, %cst [1] : vector<8x32xf32> to vector<8xf32>
    %5 = vector.shape_cast %4 : vector<8xf32> to vector<8x1xf32>
    %6 = arith.mulf %0, %0 : vector<8x32xf32>
    %cst_5 = arith.constant dense<0.000000e+00> : vector<8xf32>
    %7 = vector.multi_reduction <add>, %6, %cst_5 [1] : vector<8x32xf32> to vector<8xf32>
    %8 = vector.shape_cast %7 : vector<8xf32> to vector<8x1xf32>
    %9 = arith.mulf %1, %1 : vector<8x32xf32>
    %cst_6 = arith.constant dense<0.000000e+00> : vector<8xf32>
    %10 = vector.multi_reduction <add>, %9, %cst_6 [1] : vector<8x32xf32> to vector<8xf32>
    %11 = vector.shape_cast %10 : vector<8xf32> to vector<8x1xf32>
    %cst_7 = arith.constant 1.000000e-16 : f32
    %12 = vector.broadcast %cst_7 : f32 to vector<8x1xf32>
    %13 = arith.maximumf %8, %12 : vector<8x1xf32>
    %14 = math.rsqrt %13 : vector<8x1xf32>
    %15 = arith.mulf %5, %14 : vector<8x1xf32>
    %cst_8 = arith.constant 1.000000e-16 : f32
    %16 = vector.broadcast %cst_8 : f32 to vector<8x1xf32>
    %17 = arith.maximumf %11, %16 : vector<8x1xf32>
    %18 = math.rsqrt %17 : vector<8x1xf32>
    %19 = arith.mulf %15, %18 : vector<8x1xf32>
    %cst_9 = arith.constant 5.000000e-01 : f32
    %20 = vector.broadcast %cst_9 : f32 to vector<8x1xf32>
    %21 = arith.subf %19, %20 : vector<8x1xf32>
    %cst_10 = arith.constant 0.000000e+00 : f32
    %22 = vector.broadcast %cst_10 : f32 to vector<8x1xf32>
    %23 = arith.maximumf %21, %22 : vector<8x1xf32>
    %24 = arith.mulf %23, %23 : vector<8x1xf32>
    %cst_11 = arith.constant 1.000000e+00 : f32
    %25 = vector.broadcast %cst_11 : f32 to vector<8x1xf32>
    %26 = arith.subf %25, %19 : vector<8x1xf32>
    %27 = arith.mulf %26, %26 : vector<8x1xf32>
    %28 = arith.subf %27, %24 : vector<8x1xf32>
    %29 = arith.mulf %2, %28 : vector<8x1xf32>
    %30 = arith.addf %24, %29 : vector<8x1xf32>
    %c0_12 = arith.constant 0 : index
    %c0_13 = arith.constant 0 : index
    %31 = vector.load %arg4[%c0_12, %c0_13] : memref<8x1xf32, #tpu.memory_space<vmem>>, vector<8x1xf32>
    tpu.vector_store %arg4[%c0_12, %c0_13], %30 {strides = array<i32>} : memref<8x1xf32, #tpu.memory_space<vmem>>, vector<8x1xf32>,
    return
  }
  func.func @transform_0(%arg0: i32) -> (i32, i32) {
    %c0_i32 = arith.constant 0 : i32
    %c0_i32_0 = arith.constant 0 : i32
    return %arg0, %c0_i32 : i32, i32
  }
  func.func @transform_1(%arg0: i32) -> (i32, i32) {
    %c0_i32 = arith.constant 0 : i32
    %c0_i32_0 = arith.constant 0 : i32
    return %arg0, %c0_i32 : i32, i32
  }
  func.func @transform_2(%arg0: i32) -> (i32, i32) {
    %c0_i32 = arith.constant 0 : i32
    %c0_i32_0 = arith.constant 0 : i32
    return %arg0, %c0_i32 : i32, i32
  }
  func.func @transform_3(%arg0: i32) -> (i32, i32) {
    %c0_i32 = arith.constant 0 : i32
    %c0_i32_0 = arith.constant 0 : i32
    return %arg0, %c0_i32 : i32, i32
  }
}

</mosaic_0001>

<bundles_post_ra>
// kernel: tpu_custom_call.1
= control target key start
LH: loop header
LB: loop body
LE: loop exit
PB: predicated region body
PF: predicated region fallthrough
CT: control target
= control target key end

     0   :  { %8 = vsyncpa [#allocation3], 0  ;;  %s93_s12 = smov [#allocation2]   ;;  %s135_s0 = inlined_call_operand.vmem [shape: f32[8,32], index: 0, kind: input, shape index: {}]   ;;  %s136_s1 = inlined_call_operand.hbm [shape: f32[8,32], index: 1, kind: input, shape index: {}]   ;;  %s137_s2 = inlined_call_operand.vmem [shape: f32[8,1], index: 2, kind: input, shape index: {}]   ;;  %s138_s3 = inlined_call_operand.vmem [shape: f32[8,1], index: 3, kind: output, shape index: {}]  }
   0x1   :  { %s17_s13 = sshll.u32 %s93_s12, 4  ;;  %s69_s16 = scalar_lea.hbm %s136_s1, 128  ;;  %s18_s13 = int_to_ptr.vmem [resolvable:$true] %s17_s13 }
   0x2   :  { %p70_p0 = scmp.ne.s32.totalorder %s136_s1, %s69_s16  ;;  %p73_p1 = scmp.lt.u32.totalorder %s69_s16, %s136_s1 }
   0x4   :  { %p75_p2 = pnand %p73_p1, %p70_p0 }
   0x6   :  { %78 = shalt.err (!%p75_p2)
}
   0x7   :  { %s79_s21 = scalar_lea.vmem %s18_s13, 128  ;;  %p84_p4 = scmp.lt.s32.totalorder %s18_s13, %s18_s13 }
   0x8   :  { %p80_p3 = scmp.ne.s32.totalorder %s18_s13, %s79_s21  ;;  %p85_p5 = scmp.lt.s32.totalorder %s79_s21, %s79_s21 }
   0xa   :  { %p86_p6 = por %p85_p5, %p84_p4 }
   0xc   :  { %p87_p7 = pnand %p86_p6, %p80_p3 }
   0xe   :  { %90 = shalt.err (!%p87_p7)
}
   0xf   :  { %20 = dma.hbm_to_vmem [thread:$0]  %s136_s1, 128, %s18_s13, [#allocation3]  }
  0x10   :  { %91 = dma.done.wait [#allocation3], 128  }
  0x11   :  { %92 = vsyncadd [#allocation3], 4294967168  ;;  %v26_v0 = vld [vmem:[%s135_s0] sm:$0xff]  ;;  %vm30_vm0 = vcmask 261120   ;;  %vm56_vm1 = vcmask 7168  }
  0x12   :  { %v27_v1 = vld [vmem:[#allocation2] sm:$0xff]  ;;  %v34_v2 = vmul.f32 %v26_v0, %v26_v0 }
  0x13   :  { %v38_v3 = vmul.f32 %v27_v1, %v27_v1  ;;  %v29_v4 = vmul.f32 %v27_v1, %v26_v0  ;;  %v28_v22 = vld [vmem:[%s137_s2] sm:$0xff] }
  0x14   :  { %v35_v5 = vsel %vm30_vm0, %v34_v2, 0.0 }
  0x15   :  { %v31_v6 = vsel %vm30_vm0, %v29_v4, 0.0  ;;  %36 = vadd.xlane.f32.xlu0 %v35_v5  ;;  %v39_v7 = vsel %vm30_vm0, %v38_v3, 0.0 }
  0x16   :  { %32 = vadd.xlane.f32.xlu1 %v31_v6 }
  0x19   :  { %40 = vadd.xlane.f32.xlu0 %v39_v7 }
  0xa2   :  { %v37_v8 = vpop.xlane.xlu0 %36 }
  0xa3   :  { %v42_v9 = vmax.f32 %v37_v8, 1e-16  ;;  %v33_v13 = vpop.xlane.xlu1 %32 }
  0xa5   :  { %65 = vrsqrt.f32 %v42_v9 }
  0xa6   :  { %v41_v10 = vpop.xlane.xlu0 %40 }
  0xa7   :  { %v45_v11 = vmax.f32 %v41_v10, 1e-16 }
  0xa9   :  { %67 = vrsqrt.f32 %v45_v11 }
  0xaf   :  { %v66_v12 = vpop.eup %65 }
  0xb0   :  { %v44_v14 = vmul.f32 %v66_v12, %v33_v13 }
  0xb3   :  { %v68_v15 = vpop.eup %67 }
  0xb4   :  { %v47_v16 = vmul.f32 %v68_v15, %v44_v14 }
  0xb6   :  { %v63_v17 = vadd.f32 -0.5, %v47_v16  ;;  %v51_v18 = vsub.f32 1.0, %v47_v16 }
  0xb8   :  { %v49_v19 = vmax.f32 %v63_v17, 0.0  ;;  %v52_v21 = vmul.f32 %v51_v18, %v51_v18 }
  0xba   :  { %v50_v20 = vmul.f32 %v49_v19, %v49_v19 }
  0xbc   :  { %v53_v23 = vsub.f32 %v52_v21, %v50_v20 }
  0xbe   :  { %v54_v24 = vmul.f32 %v53_v23, %v28_v22 }
  0xc0   :  { %v55_v25 = vadd.f32 %v54_v24, %v50_v20 }
  0xc2   :  { %57 = vst.msk [vmem:[%s138_s3] sm:$0xff] %vm56_vm1, %v55_v25 }
  0xc3   :  { %62 = vsyncpa [#allocation3], 1 }

</bundles_post_ra>
